<compile_context>
chip_gen: v5e
topology: v5e:2x2
jax: 0.10.0
libtpu: 0.0.40
codegen_flags: <defaults>
</compile_context>

<pallas_src>
import functools

import jax
import jax.numpy as jnp
from jax.experimental import pallas as pl
from jax.experimental.pallas import tpu as pltpu


def _sublayer_body(x_ref, a_ref, b_ref, w_ref, bw_ref, o_ref, *,
                   eps, dropout_p, training, seed_ref=None,
                   approx_reciprocal=False):
    # x_ref: (TM, D) tile of rows; a/b/bw: (1, D); w: (D, D) in its native dtype.
    x = x_ref[...].astype(jnp.float32)
    d = x.shape[-1]

    # --- LayerNorm (torch: mean, unbiased std, divide by (std + eps)) ---
    mean = jnp.mean(x, axis=-1, keepdims=True)
    xc = x - mean
    var = jnp.sum(xc * xc, axis=-1, keepdims=True) * (1.0 / (d - 1))  # Bessel
    std = jnp.sqrt(var)
    inv = pl.reciprocal(std + eps, approx=approx_reciprocal)          # (TM, 1)
    y = a_ref[...].astype(jnp.float32) * (xc * inv) \
        + b_ref[...].astype(jnp.float32)

    # --- sublayer: Linear(size, size) on the MXU ---
    # Weight stays in its native dtype (bf16 recommended for v6e/v7x); cast the
    # activation down to match, accumulate in f32 on the MXU.
    z = jnp.dot(y.astype(w_ref.dtype), w_ref[...],
                preferred_element_type=jnp.float32) \
        + bw_ref[...].astype(jnp.float32)

    # --- dropout (train mode only; eval mode is identity like nn.Dropout) ---
    if training and dropout_p >= 1.0:
        z = jnp.zeros_like(z)  # nn.Dropout(p=1.0) zeroes everything in train
    elif training and dropout_p > 0.0:
        # TODO(synk): dropout mask uses the TPU hardware PRNG, not torch's RNG
        # stream, so train-mode outputs are not bit-comparable to PyTorch.
        pltpu.prng_seed(seed_ref[0] + pl.program_id(0))
        bits = pltpu.bitcast(pltpu.prng_random_bits(z.shape), jnp.uint32)
        thresh = jnp.uint32(min(int(dropout_p * (2.0 ** 32)), (1 << 32) - 1))
        keep = bits >= thresh
        z = jnp.where(keep, z * (1.0 / (1.0 - dropout_p)), 0.0)

    # --- residual connection ---
    o_ref[...] = (x + z).astype(o_ref.dtype)


def sublayer_connection(x, a2, b2, w, bw, *, dropout_p=0.1, training=False,
                        seed=0, eps=1e-6, tm=256, approx_reciprocal=False):
    """x: (B, S, D). Returns x + dropout(Linear(LayerNorm(x)))."""
    B, S, D = x.shape
    R = B * S
    x2 = x.reshape(R, D)

    # Row tile: large enough to fill the MXU / amortize per-step overhead, but
    # no larger than the (8-aligned) row count at toy sizes. Rows are padded up
    # to a multiple of TM (padded rows are computed but sliced off).
    TM = int(tm) if R >= tm else max(8, -(-R // 8) * 8)
    R_pad = -(-R // TM) * TM
    if R_pad != R:
        x2 = jnp.pad(x2, ((0, R_pad - R), (0, 0)))

    use_rng = training and 0.0 < dropout_p < 1.0

    body = functools.partial(_sublayer_body, eps=eps, dropout_p=dropout_p,
                             training=training,
                             approx_reciprocal=approx_reciprocal)

    if use_rng:
        def kernel(seed_ref, x_ref, a_ref, b_ref, w_ref, bw_ref, o_ref):
            body(x_ref, a_ref, b_ref, w_ref, bw_ref, o_ref, seed_ref=seed_ref)
        idx_rows = lambda i, seed_ref: (i, 0)
        idx_const = lambda i, seed_ref: (0, 0)
        num_prefetch = 1
        inputs = (jnp.array([seed], dtype=jnp.int32), x2,
                  a2.reshape(1, D), b2.reshape(1, D), w, bw.reshape(1, D))
    else:
        def kernel(x_ref, a_ref, b_ref, w_ref, bw_ref, o_ref):
            body(x_ref, a_ref, b_ref, w_ref, bw_ref, o_ref)
        idx_rows = lambda i: (i, 0)
        idx_const = lambda i: (0, 0)
        num_prefetch = 0
        inputs = (x2, a2.reshape(1, D), b2.reshape(1, D), w, bw.reshape(1, D))

    # Advisory cost estimate for XLA scheduling around the custom call.
    cost = pl.CostEstimate(
        flops=int(2 * R_pad * D * D + 10 * R_pad * D),
        transcendentals=int(R_pad),
        bytes_accessed=int(2 * R_pad * D * x.dtype.itemsize
                           + D * D * w.dtype.itemsize + 4 * D * 4),
    )

    # Explicit VMEM budget: x/out tiles (double-buffered), the resident weight
    # (worst-case double-buffered), f32 temporaries.  Capped at 64 MiB so the
    # same setting is safe on v7x's smaller physical VMEM.
    vmem_need = (4 * TM * D * max(x.dtype.itemsize, 4)
                 + 2 * D * D * w.dtype.itemsize
                 + 8 * TM * D * 4
                 + 8 * D * 4)
    vmem_limit = int(min(64 * 1024 * 1024,
                         max(32 * 1024 * 1024, int(vmem_need * 1.5))))
    # TODO(synk): for very large D (>= 4K) tile W along the output-feature axis
    # (second grid dim) instead of keeping the full (D, D) weight resident.

    out = pl.pallas_call(
        kernel,
        out_shape=jax.ShapeDtypeStruct((R_pad, D), x.dtype),
        grid_spec=pltpu.PrefetchScalarGridSpec(
            num_scalar_prefetch=num_prefetch,
            grid=(R_pad // TM,),
            in_specs=[
                pl.BlockSpec((TM, D), idx_rows),   # x rows
                pl.BlockSpec((1, D), idx_const),   # a_2
                pl.BlockSpec((1, D), idx_const),   # b_2
                pl.BlockSpec((D, D), idx_const),   # W (constant block -> resident)
                pl.BlockSpec((1, D), idx_const),   # linear bias
            ],
            out_specs=pl.BlockSpec((TM, D), idx_rows),
        ),
        compiler_params=pltpu.CompilerParams(
            dimension_semantics=("parallel",),     # rows independent; 2 TCs on v7x
            vmem_limit_bytes=vmem_limit),
        cost_estimate=cost,
    )(*inputs)

    return out[:R].reshape(B, S, D)


def _reference(x, a2, b2, w, bw, eps=1e-6):
    """Pure-JAX reference mirroring the PyTorch forward (eval mode)."""
    xf = x.astype(jnp.float32)
    mean = jnp.mean(xf, axis=-1, keepdims=True)
    xc = xf - mean
    var = jnp.sum(xc * xc, axis=-1, keepdims=True) / (xf.shape[-1] - 1)
    std = jnp.sqrt(var)
    y = a2 * xc / (std + eps) + b2
    z = jnp.einsum("bsd,de->bse", y, w.astype(jnp.float32)) + bw
    return (xf + z).astype(x.dtype)


if __name__ == "__main__":
    # Toy shapes from the module (size=32).  Real deployments should use
    # D % 128 == 0 for lane-dense stores and full MXU/VPU lane utilization.
    B, S, D = 2, 8, 32
    key = jax.random.PRNGKey(0)
    kx, kw = jax.random.split(key)

    x = jax.random.normal(kx, (B, S, D), dtype=jnp.float32)

    # LayerNorm params as in __init__: ones / zeros.
    a2 = jnp.ones((D,), dtype=jnp.float32)
    b2 = jnp.zeros((D,), dtype=jnp.float32)
    # Deterministic sublayer (Linear size->size) weights.
    w = jax.random.normal(kw, (D, D), dtype=jnp.float32) * 0.05
    bw = jnp.zeros((D,), dtype=jnp.float32)

    out = sublayer_connection(x, a2, b2, w, bw,
                              dropout_p=0.1, training=False, seed=0)
    out = jax.block_until_ready(out)

    ref = _reference(x, a2, b2, w, bw)
    assert out.shape == (B, S, D)
    assert jnp.allclose(out, ref, rtol=1e-5, atol=1e-5), "mismatch vs reference"

    print("KERNEL_OK")
</pallas_src>

<mosaic_0001>
module attributes {stable_mosaic.version = 11 : i64} {
  func.func @kernel(%arg0: i32, %arg1: memref<16x32xf32, #tpu.memory_space<vmem>>, %arg2: memref<1x32xf32, #tpu.memory_space<vmem>>, %arg3: memref<1x32xf32, #tpu.memory_space<vmem>>, %arg4: memref<32x32xf32, #tpu.memory_space<vmem>>, %arg5: memref<1x32xf32, #tpu.memory_space<vmem>>, %arg6: memref<16x32xf32, #tpu.memory_space<vmem>>) attributes {dimension_semantics = [#tpu.dimension_semantics<parallel>], iteration_bounds = array<i64: 1>, scalar_prefetch = 0 : i64, scratch_operands = 0 : i64, tpu.core_type = #tpu.core_type<tc>, window_params = [{transform_indices = @transform_0, window_bounds = array<i64: 16, 32>}, {pipeline_mode = #tpu.pipeline_mode<synchronous>, transform_indices = @transform_1, window_bounds = array<i64: 1, 32>}, {pipeline_mode = #tpu.pipeline_mode<synchronous>, transform_indices = @transform_2, window_bounds = array<i64: 1, 32>}, {pipeline_mode = #tpu.pipeline_mode<synchronous>, transform_indices = @transform_3, window_bounds = array<i64: 32, 32>}, {pipeline_mode = #tpu.pipeline_mode<synchronous>, transform_indices = @transform_4, window_bounds = array<i64: 1, 32>}, {transform_indices = @transform_5, window_bounds = array<i64: 16, 32>}]} {
    %c0 = arith.constant 0 : index
    %c0_0 = arith.constant 0 : index
    %0 = vector.load %arg1[%c0, %c0_0] : memref<16x32xf32, #tpu.memory_space<vmem>>, vector<16x32xf32>
    %cst = arith.constant dense<0.000000e+00> : vector<16xf32>
    %1 = vector.multi_reduction <add>, %0, %cst [1] : vector<16x32xf32> to vector<16xf32>
    %2 = vector.shape_cast %1 : vector<16xf32> to vector<16x1xf32>
    %cst_1 = arith.constant 3.200000e+01 : f32
    %3 = vector.broadcast %cst_1 : f32 to vector<16x1xf32>
    %4 = arith.divf %2, %3 : vector<16x1xf32>
    %5 = vector.broadcast %4 : vector<16x1xf32> to vector<16x32xf32>
    %6 = arith.subf %0, %5 : vector<16x32xf32>
    %7 = arith.mulf %6, %6 : vector<16x32xf32>
    %cst_2 = arith.constant dense<0.000000e+00> : vector<16xf32>
    %8 = vector.multi_reduction <add>, %7, %cst_2 [1] : vector<16x32xf32> to vector<16xf32>
    %9 = vector.shape_cast %8 : vector<16xf32> to vector<16x1xf32>
    %cst_3 = arith.constant 0.0322580636 : f32
    %10 = vector.broadcast %cst_3 : f32 to vector<16x1xf32>
    %11 = arith.mulf %9, %10 : vector<16x1xf32>
    %12 = math.sqrt %11 : vector<16x1xf32>
    %cst_4 = arith.constant 9.99999997E-7 : f32
    %13 = vector.broadcast %cst_4 : f32 to vector<16x1xf32>
    %14 = arith.addf %12, %13 : vector<16x1xf32>
    %15 = tpu.reciprocal %14 : vector<16x1xf32> -> vector<16x1xf32>
    %c0_5 = arith.constant 0 : index
    %c0_6 = arith.constant 0 : index
    %16 = vector.load %arg2[%c0_5, %c0_6] : memref<1x32xf32, #tpu.memory_space<vmem>>, vector<1x32xf32>
    %17 = vector.broadcast %15 : vector<16x1xf32> to vector<16x32xf32>
    %18 = arith.mulf %6, %17 : vector<16x32xf32>
    %19 = vector.broadcast %16 : vector<1x32xf32> to vector<16x32xf32>
    %20 = arith.mulf %19, %18 : vector<16x32xf32>
    %c0_7 = arith.constant 0 : index
    %c0_8 = arith.constant 0 : index
    %21 = vector.load %arg3[%c0_7, %c0_8] : memref<1x32xf32, #tpu.memory_space<vmem>>, vector<1x32xf32>
    %22 = vector.broadcast %21 : vector<1x32xf32> to vector<16x32xf32>
    %23 = arith.addf %20, %22 : vector<16x32xf32>
    %c0_9 = arith.constant 0 : index
    %c0_10 = arith.constant 0 : index
    %24 = vector.load %arg4[%c0_9, %c0_10] : memref<32x32xf32, #tpu.memory_space<vmem>>, vector<32x32xf32>
    %cst_11 = arith.constant dense<0.000000e+00> : vector<16x32xf32>
    %25 = tpu.matmul %23, %24, %cst_11 {dimension_numbers = #tpu.dot_dimension_numbers<[1], [0], [0], [1], [0, 0, 1, 1], [], []>} : vector<16x32xf32>, vector<32x32xf32>, vector<16x32xf32> -> vector<16x32xf32>
    %c0_12 = arith.constant 0 : index
    %c0_13 = arith.constant 0 : index
    %26 = vector.load %arg5[%c0_12, %c0_13] : memref<1x32xf32, #tpu.memory_space<vmem>>, vector<1x32xf32>
    %27 = vector.broadcast %26 : vector<1x32xf32> to vector<16x32xf32>
    %28 = arith.addf %25, %27 : vector<16x32xf32>
    %29 = arith.addf %0, %28 : vector<16x32xf32>
    %c0_14 = arith.constant 0 : index
    %c0_15 = arith.constant 0 : index
    %30 = vector.load %arg6[%c0_14, %c0_15] : memref<16x32xf32, #tpu.memory_space<vmem>>, vector<16x32xf32>
    tpu.vector_store %arg6[%c0_14, %c0_15], %29 {strides = array<i32>} : memref<16x32xf32, #tpu.memory_space<vmem>>, vector<16x32xf32>,
    return
  }
  func.func @transform_0(%arg0: i32) -> (i32, i32) {
    %c0_i32 = arith.constant 0 : i32
    %c0_i32_0 = arith.constant 0 : i32
    return %arg0, %c0_i32 : i32, i32
  }
  func.func @transform_1(%arg0: i32) -> (i32, i32) {
    %c0_i32 = arith.constant 0 : i32
    %c0_i32_0 = arith.constant 0 : i32
    %c0_i32_1 = arith.constant 0 : i32
    return %c0_i32, %c0_i32_0 : i32, i32
  }
  func.func @transform_2(%arg0: i32) -> (i32, i32) {
    %c0_i32 = arith.constant 0 : i32
    %c0_i32_0 = arith.constant 0 : i32
    %c0_i32_1 = arith.constant 0 : i32
    return %c0_i32, %c0_i32_0 : i32, i32
  }
  func.func @transform_3(%arg0: i32) -> (i32, i32) {
    %c0_i32 = arith.constant 0 : i32
    %c0_i32_0 = arith.constant 0 : i32
    %c0_i32_1 = arith.constant 0 : i32
    return %c0_i32, %c0_i32_0 : i32, i32
  }
  func.func @transform_4(%arg0: i32) -> (i32, i32) {
    %c0_i32 = arith.constant 0 : i32
    %c0_i32_0 = arith.constant 0 : i32
    %c0_i32_1 = arith.constant 0 : i32
    return %c0_i32, %c0_i32_0 : i32, i32
  }
  func.func @transform_5(%arg0: i32) -> (i32, i32) {
    %c0_i32 = arith.constant 0 : i32
    %c0_i32_0 = arith.constant 0 : i32
    return %arg0, %c0_i32 : i32, i32
  }
}

</mosaic_0001>

<bundles_post_ra>
// kernel: tpu_custom_call.1
= control target key start
LH: loop header
LB: loop body
LE: loop exit
PB: predicated region body
PF: predicated region fallthrough
CT: control target
= control target key end

     0   :  { %10 = vsyncpa [#allocation3], 0  ;;  %s445_s0 = inlined_call_operand.hbm [shape: f32[16,32], index: 0, kind: input, shape index: {}]   ;;  %s446_s1 = inlined_call_operand.hbm [shape: f32[1,32], index: 1, kind: input, shape index: {}]   ;;  %s447_s2 = inlined_call_operand.vmem [shape: f32[1,32], index: 2, kind: input, shape index: {}]   ;;  %s448_s3 = inlined_call_operand.hbm [shape: f32[32,32], index: 3, kind: input, shape index: {}]   ;;  %s449_s4 = inlined_call_operand.vmem [shape: f32[1,32], index: 4, kind: input, shape index: {}]   ;;  %s450_s5 = inlined_call_operand.hbm [shape: f32[16,32], index: 5, kind: output, shape index: {}]  }
   0x1   :  { %11 = vsyncpa [#allocation6], 0  ;;  %s31_s20 = sshll.u32 %s446_s1, 4  ;;  %s32_s20 = int_to_ptr.hbm [resolvable:$true] %s31_s20 }
   0x2   :  { %12 = vsyncpa [#allocation4], 0  ;;  %s353_s21 = smov [#allocation5]   ;;  %s17_s25 = sshll.u32 %s445_s0, 4  ;;  %s18_s25 = int_to_ptr.hbm [resolvable:$true] %s17_s25 }
   0x3   :  { %s33_s22 = sshll.u32 %s353_s21, 4  ;;  %s354_s26 = smov [#allocation2]   ;;  %s34_s22 = int_to_ptr.vmem [resolvable:$true] %s33_s22 }
   0x4   :  { %36 = dma.hbm_to_vmem [thread:$0]  %s32_s20, 16, %s34_s22, [#allocation6]  }
   0x5   :  { %s19_s27 = sshll.u32 %s354_s26, 4  ;;  %s355_s28 = smov 128   ;;  %s20_s27 = int_to_ptr.vmem [resolvable:$true] %s19_s27 }
   0x6   :  { %s356_s29 = smov 8   ;;  %s43_s6 = sshll.u32 %s448_s3, 4  ;;  %s44_s6 = int_to_ptr.hbm [resolvable:$true] %s43_s6 }
   0x7   :  { %25 = dma.hbm_to_vmem [thread:$0]  %s18_s25, 256, %s20_s27, [#allocation3], %s355_s28, %s355_s28, %s356_s29  }
   0x8   :  { %s357_s7 = smov [#allocation7]  }
   0x9   :  { %s45_s8 = sshll.u32 %s357_s7, 4  ;;  %s46_s8 = int_to_ptr.vmem [resolvable:$true] %s45_s8 }
   0xa   :  { %51 = dma.hbm_to_vmem [thread:$0]  %s44_s6, 512, %s46_s8, [#allocation6], %s355_s28, %s355_s28, %s356_s29  }
   0xb   :  { %347 = dma.done.wait [#allocation3], 256  }
   0xc   :  { %348 = vsyncadd [#allocation3], 4294967040 }
   0xd   :  { %349 = dma.done.wait [#allocation6], 528  }
   0xe   :  { %350 = vsyncadd [#allocation6], 4294966768  ;;  %vm68_vm0 = vcmask 261120   ;;  %v405_v0 = vld [vmem:[#allocation2] sm:$0xff]  ;;  %v409_v2 = vld [vmem:[#allocation2 + $0x8] sm:$0xff]  ;;  %v358_v4 = vmov 32.0  }
   0xf   :  { %v69_v1 = vsel %vm68_vm0, %v405_v0, 0.0  ;;  %v72_v3 = vsel %vm68_vm0, %v409_v2, 0.0  ;;  %241 = vrcp.f32 %v358_v4  ;;  %v167_v21 = vld [vmem:[#allocation7 + $0x18] sm:$0xff]  ;;  %v166_v22 = vld [vmem:[#allocation7 + $0x10] sm:$0xff]  ;;  %v165_v24 = vld [vmem:[#allocation7 + $0x8] sm:$0xff]  ;;  %s359_s10 = smov [#allocation8]  }
  0x10   :  { %70 = vadd.xlane.f32.xlu0 %v69_v1  ;;  %190 = vmatpush.msra.mxu0 %v167_v21  ;;  %v164_v26 = vld [vmem:[#allocation7] sm:$0xff]  ;;  %v238_v61 = vld [vmem:[#allocation5] ss:$0 sm:$0xff]  ;;  %s209_s11 = sshll.u32 %s359_s10, 4  ;;  %s211_s14 = sshll.u32 %s450_s5, 4  ;;  %s210_s11 = int_to_ptr.vmem [resolvable:$true] %s209_s11  ;;  %s212_s14 = int_to_ptr.hbm [resolvable:$true] %s211_s14 }
  0x11   :  { %227 = vmatpush.msra.mxu1 %v167_v21 }
  0x12   :  { %191 = vmatpush.msra.mxu0 %v166_v22 }
  0x13   :  { %228 = vmatpush.msra.mxu1 %v166_v22 }
  0x14   :  { %192 = vmatpush.msra.mxu0 %v165_v24 }
  0x15   :  { %v242_v5 = vpop.eup %241  ;;  %229 = vmatpush.msra.mxu1 %v165_v24 }
  0x16   :  { %v76_v6 = vmul.f32 32.0, %v242_v5  ;;  %vm80_vm1 = vweird.f32 %v242_v5  ;;  %193 = vmatpush.msra.mxu0 %v164_v26 }
  0x17   :  { %230 = vmatpush.msra.mxu1 %v164_v26 }
  0x18   :  { %73 = vadd.xlane.f32.xlu0 %v72_v3  ;;  %v77_v7 = vsub.f32 1.0, %v76_v6  ;;  %v239_v3 = vld [vmem:[%s447_s2] ss:$0 sm:$0xff] }
  0x1a   :  { %v78_v8 = vmul.f32 %v242_v5, %v77_v7 }
  0x1c   :  { %v79_v9 = vadd.f32 %v242_v5, %v78_v8 }
  0x1e   :  { %v81_v10 = vsel %vm80_vm1, %v242_v5, %v79_v9 }
  0x83   :  { %v71_v11 = vpop.xlane.xlu0 %70 }
  0x84   :  { %v82_v12 = vmul.f32 %v81_v10, %v71_v11 }
  0x86   :  { %v414_v13 = vsub.f32 %v405_v0, %v82_v12 }
  0x88   :  { %v86_v14 = vmul.f32 %v414_v13, %v414_v13 }
  0x8a   :  { %v88_v15 = vsel %vm68_vm0, %v86_v14, 0.0 }
  0x8b   :  { %89 = vadd.xlane.f32.xlu1 %v88_v15  ;;  %v74_v16 = vpop.xlane.xlu0 %73 }
  0x8c   :  { %v83_v17 = vmul.f32 %v81_v10, %v74_v16 }
  0x8e   :  { %v420_v18 = vsub.f32 %v409_v2, %v83_v17  ;;  %v240_v17 = vld [vmem:[%s449_s4] ss:$0 sm:$0xff] }
  0x90   :  { %v87_v19 = vmul.f32 %v420_v18, %v420_v18 }
  0x92   :  { %v91_v20 = vsel %vm68_vm0, %v87_v19, 0.0 }
  0x93   :  { %92 = vadd.xlane.f32.xlu1 %v91_v20 }
  0xfe   :  { %v90_v23 = vpop.xlane.xlu1 %89 }
  0xff   :  { %v94_v25 = vmul.f32 0.032258064, %v90_v23 }
 0x101   :  { %243 = vrsqrt.f32 %v94_v25  ;;  %vm103_vm2 = vcmp.eq.f32.partialorder %v94_v25, inf  ;;  %v106_v39 = vand.u32 2147483648, %v94_v25  ;;  %vm105_vm3 = vcmp.eq.f32.partialorder %v94_v25, 0.0 }
 0x106   :  { %v93_v27 = vpop.xlane.xlu1 %92 }
 0x107   :  { %v244_v28 = vpop.eup %243  ;;  %v95_v29 = vmul.f32 0.032258064, %v93_v27 }
 0x108   :  { %v97_v30 = vmul.f32 %v244_v28, %v94_v25 }
 0x109   :  { %245 = vrsqrt.f32 %v95_v29  ;;  %vm115_vm4 = vcmp.eq.f32.partialorder %v95_v29, inf  ;;  %v118_v47 = vand.u32 2147483648, %v95_v29  ;;  %vm117_vm5 = vcmp.eq.f32.partialorder %v95_v29, 0.0 }
 0x10a   :  { %v98_v31 = vmul.f32 %v244_v28, %v97_v30 }
 0x10c   :  { %v99_v32 = vmul.f32 0.5, %v98_v31 }
 0x10e   :  { %v100_v33 = vsub.f32 1.5, %v99_v32 }
 0x10f   :  { %v246_v34 = vpop.eup %245 }
 0x110   :  { %v101_v35 = vmul.f32 %v244_v28, %v100_v33  ;;  %v109_v36 = vmul.f32 %v246_v34, %v95_v29 }
 0x112   :  { %v102_v37 = vmul.f32 %v101_v35, %v94_v25  ;;  %v110_v38 = vmul.f32 %v246_v34, %v109_v36 }
 0x114   :  { %v104_v40 = vsel %vm103_vm2, %v94_v25, %v102_v37  ;;  %v111_v41 = vmul.f32 0.5, %v110_v38 }
 0x115   :  { %v107_v42 = vsel %vm105_vm3, %v106_v39, %v104_v40 }
 0x116   :  { %v112_v43 = vsub.f32 1.5, %v111_v41  ;;  %v120_v44 = vadd.f32 1e-06, %v107_v42 }
 0x118   :  { %v113_v45 = vmul.f32 %v246_v34, %v112_v43  ;;  %247 = vrcp.f32 %v120_v44  ;;  %v133_v54 = vand.u32 2147483648, %v120_v44  ;;  %v131_v56 = vand.u32 2147483647, %v120_v44 }
 0x119   :  { %vm127_vm7 = vweird.f32 %v120_v44 }
 0x11a   :  { %v114_v46 = vmul.f32 %v113_v45, %v95_v29  ;;  %v134_v59 = vor.u32 1.1754944e-38, %v133_v54  ;;  %vm132_vm9 = vcmp.eq.f32.partialorder %v131_v56, 8.507059e+37 }
 0x11c   :  { %v116_v48 = vsel %vm115_vm4, %v95_v29, %v114_v46 }
 0x11d   :  { %v119_v49 = vsel %vm117_vm5, %v118_v47, %v116_v48 }
 0x11e   :  { %v248_v50 = vpop.eup %247  ;;  %v121_v51 = vadd.f32 1e-06, %v119_v49 }
 0x11f   :  { %v123_v52 = vmul.f32 %v248_v50, %v120_v44  ;;  %vm128_vm6 = vweird.f32 %v248_v50 }
 0x120   :  { %249 = vrcp.f32 %v121_v51  ;;  %vm129_vm8 = vmor %vm127_vm7, %vm128_vm6  ;;  %v147_v5 = vand.u32 2147483648, %v121_v51  ;;  %v145_v8 = vand.u32 2147483647, %v121_v51  ;;  %vm141_vm11 = vweird.f32 %v121_v51 }
 0x121   :  { %v124_v53 = vsub.f32 1.0, %v123_v52 }
 0x122   :  { %v148_v11 = vor.u32 1.1754944e-38, %v147_v5  ;;  %vm146_vm13 = vcmp.eq.f32.partialorder %v145_v8, 8.507059e+37 }
 0x123   :  { %v125_v55 = vmul.f32 %v248_v50, %v124_v53 }
 0x125   :  { %v126_v57 = vadd.f32 %v248_v50, %v125_v55 }
 0x126   :  { %v250_v58 = vpop.eup %249 }
 0x127   :  { %v130_v60 = vsel %vm129_vm8, %v248_v50, %v126_v57  ;;  %v137_v62 = vmul.f32 %v250_v58, %v121_v51  ;;  %vm142_vm10 = vweird.f32 %v250_v58 }
 0x128   :  { %v135_v63 = vsel %vm132_vm9, %v134_v59, %v130_v60  ;;  %vm143_vm12 = vmor %vm141_vm11, %vm142_vm10 }
 0x129   :  { %v151_v1 = vmul.f32 %v135_v63, %v414_v13  ;;  %v138_v4 = vsub.f32 1.0, %v137_v62 }
 0x12b   :  { %v156_v6 = vmul.f32 %v238_v61, %v151_v1  ;;  %v139_v7 = vmul.f32 %v250_v58, %v138_v4 }
 0x12d   :  { %v162_v9 = vadd.f32 %v239_v3, %v156_v6  ;;  %v140_v10 = vadd.f32 %v250_v58, %v139_v7 }
 0x12f   :  { %225 = vmatmul.msk.f32.vlgmr.msra.gmra.mxu0 %vm68_vm0, %v162_v9  ;;  %v144_v12 = vsel %vm143_vm12, %v250_v58, %v140_v10 }
 0x130   :  { %v149_v13 = vsel %vm146_vm13, %v148_v11, %v144_v12 }
 0x131   :  { %v152_v14 = vmul.f32 %v149_v13, %v420_v18 }
 0x133   :  { %v157_v15 = vmul.f32 %v238_v61, %v152_v14 }
 0x135   :  { %v163_v16 = vadd.f32 %v239_v3, %v157_v15 }
 0x137   :  { %226 = vmatmul.msk.f32.vlgmr.msra.gmra.mxu1 %vm68_vm0, %v163_v16 }
 0x1ac   :  { %v195_v19 = vpop.f32.mrf.mxu0 }
 0x1ad   :  { %v196_v20 = vadd.f32 %v240_v17, %v195_v19 }
 0x1af   :  { %v201_v21 = vadd.f32 %v196_v20, %v405_v0 }
 0x1b1   :  { %203 = vst.msk [vmem:[#allocation8] sm:$0xff] %vm68_vm0, %v201_v21 }
 0x1b4   :  { %v198_v22 = vpop.f32.mrf.mxu1 }
 0x1b5   :  { %v199_v18 = vadd.f32 %v240_v17, %v198_v22 }
 0x1b7   :  { %v202_v23 = vadd.f32 %v199_v18, %v409_v2 }
 0x1b9   :  { %204 = vst.msk [vmem:[#allocation8 + $0x8] sm:$0xff] %vm68_vm0, %v202_v23 }
 0x1ba   :  { %217 = dma.vmem_to_hbm [thread:$0]  %s210_s11, 256, %s212_s14, [#allocation4], %s355_s28, %s355_s28, %s356_s29  }
 0x1bb   :  { %351 = dma.done.wait [#allocation4], 256  }
 0x1bc   :  { %352 = vsyncadd [#allocation4], 4294967040 }
 0x1bd   :  { %222 = vsyncpa [#allocation3], 1 }
 0x1be   :  { %223 = vsyncpa [#allocation6], 1 }
 0x1bf   :  { %224 = vsyncpa [#allocation4], 1 }

</bundles_post_ra>
